<compile_context>
chip_gen: v7x
topology: tpu7x:2x2x1
jax: 0.10.0
libtpu: 0.0.40
codegen_flags: <defaults>
</compile_context>

<pallas_src>
import math
import functools

import jax
import jax.numpy as jnp
from jax.experimental import pallas as pl
from jax.experimental.pallas import tpu as pltpu


_SQRT_2_OVER_PI = math.sqrt(2.0 / math.pi)


def _gelu_tanh(x):
    # Matches torch.nn.GELU(approximate='tanh'):
    # 0.5 * x * (1 + tanh(sqrt(2/pi) * (x + 0.044715 * x^3)))
    return 0.5 * x * (1.0 + jnp.tanh(_SQRT_2_OVER_PI * (x + 0.044715 * x * x * x)))


# --------------------------------------------------------------------------- #
# Kernel bodies
# --------------------------------------------------------------------------- #
def _mlp_body(x_ref, w1_ref, b1_ref, w2_ref, b2_ref, o_ref, acc_ref):
    # x_ref:  (tm, E)   w1_ref: (E, th)   b1_ref: (1, th)
    # w2_ref: (th, E)   b2_ref: (1, E)    o_ref:  (tm, E)
    # acc_ref: (tm, E) f32, resident across the h (hidden) grid axis.
    # acc_ref may alias o_ref when the output dtype is f32.
    h_idx = pl.program_id(1)

    @pl.when(h_idx == 0)
    def _():
        acc_ref[...] = jnp.zeros_like(acc_ref)

    # Partial hidden slice: x @ W1[:, h*th:(h+1)*th] + b1[h*th:(h+1)*th]
    hid = jnp.dot(x_ref[...], w1_ref[...], preferred_element_type=jnp.float32)
    hid = hid + b1_ref[...].astype(jnp.float32)
    # GELU is elementwise in the hidden dim -> exact under h-tiling (f32 VPU/EUP;
    # keeping it f32 is v5e-safe and the MXU dominates VALU here anyway).
    g = _gelu_tanh(hid)
    acc_ref[...] += jnp.dot(g.astype(w2_ref.dtype), w2_ref[...],
                            preferred_element_type=jnp.float32)

    @pl.when(h_idx == pl.num_programs(1) - 1)
    def _():
        o_ref[...] = (acc_ref[...] + b2_ref[...].astype(jnp.float32)).astype(o_ref.dtype)


def _mlp_kernel_acc_in_out(x_ref, w1_ref, b1_ref, w2_ref, b2_ref, o_ref):
    # f32 output: accumulate straight into the h-invariant output block.
    _mlp_body(x_ref, w1_ref, b1_ref, w2_ref, b2_ref, o_ref, o_ref)


def _mlp_kernel_scratch(x_ref, w1_ref, b1_ref, w2_ref, b2_ref, o_ref, acc_ref):
    # bf16 (or other narrow) output: f32 scratch accumulator.
    _mlp_body(x_ref, w1_ref, b1_ref, w2_ref, b2_ref, o_ref, acc_ref)


# --------------------------------------------------------------------------- #
# Tile / VMEM planning
# --------------------------------------------------------------------------- #
def _round_up(x, m):
    return ((x + m - 1) // m) * m


def _tpu_vmem_capacity_bytes():
    try:
        info = pltpu.get_tpu_info()
        cap = getattr(info, "vmem_capacity_bytes", None)
        if cap:
            return int(cap)
    except Exception:
        pass
    # Conservative (v7x-sized) fallback; safe on every generation.
    return 64 * 1024 * 1024


def _vmem_bytes(tm, th, E, in_size, out_size, acc_in_out):
    b = 2 * tm * E * in_size       # x row tile (double-buffered)
    b += 2 * E * th * in_size      # W1 column block
    b += 2 * th * E * in_size      # W2 row block
    b += 2 * tm * E * out_size     # output tile
    b += 2 * (th + E) * 4          # biases (tiny)
    if not acc_in_out:
        b += tm * E * 4            # f32 accumulator scratch
    return b


def _choose_tiles(M, E, H, in_size, out_size, acc_in_out, big_vmem):
    # Row tile: MXU-native (multiple of 256) and big enough that weight
    # re-streaming stays under the compute roofline (tm >= ~650 on v6e,
    # ~310+ on v7x).  Guarantee >= 2 row tiles when possible so the
    # "parallel" axis shards across v7x's 2 TensorCores.
    tm_cap = 1024 if big_vmem else 512
    if M <= 128:
        tm = _round_up(max(M, 8), 16)                 # tiny problem: one tile
    else:
        tm = min(tm_cap, _round_up(M, 256))
        if _round_up(M, tm) // tm < 2:
            tm = max(128, _round_up((M + 1) // 2, 128))

    # Hidden tile: largest power-of-two block dividing H.
    th = H
    for cand in ((1024, 512, 256, 128) if big_vmem else (512, 256, 128)):
        if H % cand == 0:
            th = cand
            break

    # Scoped-VMEM cap per generation; shrink tiles until the working set fits.
    cap = (100 if big_vmem else 56) * 1024 * 1024
    while _vmem_bytes(tm, th, E, in_size, out_size, acc_in_out) > int(cap * 0.85):
        if th > 128:
            th //= 2               # power-of-two factor of H, still divides H
        elif tm > 128:
            tm = max(128, tm // 2)
        else:
            break
    return tm, th, cap


# --------------------------------------------------------------------------- #
# pallas_call wrapper
# --------------------------------------------------------------------------- #
@functools.partial(
    jax.jit,
    static_argnames=("tm", "th", "vmem_limit", "bf16_matmul", "weight_buffers"))
def _mlp_pallas(x2d, w1, b1, w2, b2, *, tm, th, vmem_limit, bf16_matmul,
                weight_buffers=None):
    M, E = x2d.shape
    H = w1.shape[1]
    out_dtype = x2d.dtype

    if bf16_matmul and x2d.dtype == jnp.float32:
        # bf16 MXU matmuls (2-4x faster than f32 on all generations);
        # accumulation / GELU / bias adds / output stay f32.
        x2d = x2d.astype(jnp.bfloat16)
        w1 = w1.astype(jnp.bfloat16)
        w2 = w2.astype(jnp.bfloat16)

    acc_in_out = out_dtype == jnp.float32

    Mp = _round_up(M, tm)
    if Mp != M:
        x2d = jnp.pad(x2d, ((0, Mp - M), (0, 0)))

    b1_2d = b1.reshape(1, H)
    b2_2d = b2.reshape(1, E)

    # Honest HBM traffic: x + out once, weights re-streamed once per row tile.
    n_row_tiles = Mp // tm
    w_bytes = (w1.size * w1.dtype.itemsize + w2.size * w2.dtype.itemsize
               + b1.size * b1.dtype.itemsize + b2.size * b2.dtype.itemsize)
    cost = pl.CostEstimate(
        flops=4 * Mp * E * H,                        # two matmuls, 2*M*E*H each
        transcendentals=Mp * H,                      # tanh per hidden element
        bytes_accessed=(Mp * E * x2d.dtype.itemsize
                        + Mp * E * jnp.dtype(out_dtype).itemsize
                        + n_row_tiles * w_bytes),
    )

    # Optional deeper pipelining for the streamed weight blocks (v5e/v6e only;
    # v7x's 64 MiB budget can't spare the extra buffers).
    w_kwargs = {}
    if weight_buffers is not None and weight_buffers > 2:
        w_kwargs = dict(pipeline_mode=pl.Buffered(weight_buffers))

    kernel = _mlp_kernel_acc_in_out if acc_in_out else _mlp_kernel_scratch
    scratch = [] if acc_in_out else [pltpu.VMEM((tm, E), jnp.float32)]

    out2d = pl.pallas_call(
        kernel,
        out_shape=jax.ShapeDtypeStruct((Mp, E), out_dtype),
        grid_spec=pltpu.PrefetchScalarGridSpec(
            num_scalar_prefetch=0,
            grid=(Mp // tm, H // th),
            in_specs=[
                pl.BlockSpec((tm, E), lambda i, h: (i, 0)),              # x (h-invariant)
                pl.BlockSpec((E, th), lambda i, h: (0, h), **w_kwargs),  # W1 col block
                pl.BlockSpec((1, th), lambda i, h: (0, h)),              # b1 slice
                pl.BlockSpec((th, E), lambda i, h: (h, 0), **w_kwargs),  # W2 row block
                pl.BlockSpec((1, E), lambda i, h: (0, 0)),               # b2 (constant)
            ],
            out_specs=pl.BlockSpec((tm, E), lambda i, h: (i, 0)),
            scratch_shapes=scratch,
        ),
        compiler_params=pltpu.CompilerParams(
            dimension_semantics=("parallel", "arbitrary"),
            vmem_limit_bytes=vmem_limit,
        ),
        cost_estimate=cost,
    )(x2d, w1, b1_2d, w2, b2_2d)

    if Mp != M:
        out2d = out2d[:M]
    return out2d


def mlp_forward(x, w1, b1, w2, b2, *, tm=None, th=None, bf16_matmul=True,
                weight_buffers=None):
    """GPT MLP forward.  x: (B, T, E). w1: (E, 4E), b1: (4E,), w2: (4E, E), b2: (E,).

    Weights are stored transposed relative to torch (in_features, out_features).
    """
    B, T, E = x.shape
    H = w1.shape[1]
    M = B * T

    cast = bf16_matmul and x.dtype == jnp.float32
    in_size = 2 if (cast or x.dtype == jnp.bfloat16) else jnp.dtype(x.dtype).itemsize
    out_size = jnp.dtype(x.dtype).itemsize
    acc_in_out = x.dtype == jnp.float32

    vmem_cap = _tpu_vmem_capacity_bytes()
    big_vmem = vmem_cap >= 100 * 1024 * 1024          # v5e/v6e: 128 MiB; v7x: 64 MiB
    tm_auto, th_auto, limit_cap = _choose_tiles(
        M, E, H, in_size, out_size, acc_in_out, big_vmem)
    if tm is None:
        tm = tm_auto
    if th is None:
        th = th_auto
    assert H % th == 0, f"th={th} must divide H={H}"

    out2d = _mlp_pallas(x.reshape(M, E), w1, b1, w2, b2,
                        tm=tm, th=th, vmem_limit=limit_cap,
                        bf16_matmul=bf16_matmul, weight_buffers=weight_buffers)
    return out2d.reshape(B, T, E)


# --------------------------------------------------------------------------- #
# Init / reference
# --------------------------------------------------------------------------- #
def init_params(key, embed_dim, dtype=jnp.float32):
    """Mirrors nn.Linear defaults (uniform +-1/sqrt(fan_in)); weights stored
    transposed relative to torch: (in_features, out_features)."""
    hidden = 4 * embed_dim
    k1, k2, k3, k4 = jax.random.split(key, 4)
    bound1 = 1.0 / math.sqrt(embed_dim)
    bound2 = 1.0 / math.sqrt(hidden)
    w1 = jax.random.uniform(k1, (embed_dim, hidden), dtype, -bound1, bound1)
    b1 = jax.random.uniform(k2, (hidden,), dtype, -bound1, bound1)
    w2 = jax.random.uniform(k3, (hidden, embed_dim), dtype, -bound2, bound2)
    b2 = jax.random.uniform(k4, (embed_dim,), dtype, -bound2, bound2)
    return w1, b1, w2, b2


def mlp_reference(x, w1, b1, w2, b2):
    h = jnp.dot(x, w1, precision=jax.lax.Precision.HIGHEST) + b1
    g = _gelu_tanh(h)
    return jnp.dot(g, w2, precision=jax.lax.Precision.HIGHEST) + b2


# --------------------------------------------------------------------------- #
# Self-test
# --------------------------------------------------------------------------- #
if __name__ == "__main__":
    key = jax.random.PRNGKey(0)
    kx, kp, kx2, kp2, kx3 = jax.random.split(key, 5)

    # Small GPT-style shapes: batch=2, seq=8, embed_dim=32 (hidden=128).
    B, T, E = 2, 8, 32
    x = jax.random.normal(kx, (B, T, E), dtype=jnp.float32)
    w1, b1, w2, b2 = init_params(kp, E)
    ref = mlp_reference(x, w1, b1, w2, b2)

    # 1) Exact f32 path (no bf16 auto-cast), accumulation directly in o_ref.
    out_f32 = jax.block_until_ready(
        mlp_forward(x, w1, b1, w2, b2, bf16_matmul=False))
    assert out_f32.shape == (B, T, E)
    assert jnp.allclose(out_f32, ref, atol=1e-4, rtol=1e-4)

    # 2) Default path: auto bf16 matmuls, f32 accumulation / GELU / output.
    out_def = jax.block_until_ready(mlp_forward(x, w1, b1, w2, b2))
    assert jnp.allclose(out_def, ref, atol=0.1, rtol=0.1)

    # 3) Reduction grid + multiple row tiles (E=64 -> H=256: 2 h-steps, 2 row tiles).
    E2 = 64
    x2 = jax.random.normal(kx2, (B, T, E2), dtype=jnp.float32)
    w1b, b1b, w2b, b2b = init_params(kp2, E2)
    out2 = jax.block_until_ready(
        mlp_forward(x2, w1b, b1b, w2b, b2b, tm=8, th=128, bf16_matmul=False))
    assert jnp.allclose(out2, mlp_reference(x2, w1b, b1b, w2b, b2b),
                        atol=1e-4, rtol=1e-4)

    # 4) Row-padding path (M = 14 padded up to the tile multiple).
    x_odd = jax.random.normal(kx3, (2, 7, E), dtype=jnp.float32)
    out_odd = jax.block_until_ready(
        mlp_forward(x_odd, w1, b1, w2, b2, bf16_matmul=False))
    assert jnp.allclose(out_odd, mlp_reference(x_odd, w1, b1, w2, b2),
                        atol=1e-4, rtol=1e-4)

    # 5) bf16-in / bf16-out path (scratch-accumulator kernel variant).
    xb = x.astype(jnp.bfloat16)
    w1c, b1c, w2c, b2c = (a.astype(jnp.bfloat16) for a in (w1, b1, w2, b2))
    out_bf16 = jax.block_until_ready(mlp_forward(xb, w1c, b1c, w2c, b2c))
    assert out_bf16.dtype == jnp.bfloat16
    assert jnp.allclose(out_bf16.astype(jnp.float32), ref, atol=0.1, rtol=0.1)

    print("KERNEL_OK")
</pallas_src>

<mosaic_0001>
module attributes {stable_mosaic.version = 11 : i64} {
  func.func @_mlp_kernel_acc_in_out(%arg0: i32, %arg1: i32, %arg2: memref<16x32xf32, #tpu.memory_space<vmem>>, %arg3: memref<32x128xf32, #tpu.memory_space<vmem>>, %arg4: memref<1x128xf32, #tpu.memory_space<vmem>>, %arg5: memref<128x32xf32, #tpu.memory_space<vmem>>, %arg6: memref<1x32xf32, #tpu.memory_space<vmem>>, %arg7: memref<16x32xf32, #tpu.memory_space<vmem>>) attributes {dimension_semantics = [#tpu.dimension_semantics<parallel>, #tpu.dimension_semantics<arbitrary>], iteration_bounds = array<i64: 1, 1>, scalar_prefetch = 0 : i64, scratch_operands = 0 : i64, tpu.core_type = #tpu.core_type<tc>, window_params = [{transform_indices = @transform_0, window_bounds = array<i64: 16, 32>}, {transform_indices = @transform_1, window_bounds = array<i64: 32, 128>}, {transform_indices = @transform_2, window_bounds = array<i64: 1, 128>}, {transform_indices = @transform_3, window_bounds = array<i64: 128, 32>}, {pipeline_mode = #tpu.pipeline_mode<synchronous>, transform_indices = @transform_4, window_bounds = array<i64: 1, 32>}, {transform_indices = @transform_5, window_bounds = array<i64: 16, 32>}]} {
    %c0_i32 = arith.constant 0 : i32
    %0 = arith.cmpi eq, %arg1, %c0_i32 : i32
    %1 = arith.extui %0 : i1 to i32
    %c0_i32_0 = arith.constant 0 : i32
    %2 = arith.cmpi ne, %1, %c0_i32_0 : i32
    scf.if %2 {
      %cst_19 = arith.constant 0.000000e+00 : f32
      %30 = vector.broadcast %cst_19 : f32 to vector<16x32xf32>
      %c0_20 = arith.constant 0 : index
      %c0_21 = arith.constant 0 : index
      %31 = vector.load %arg7[%c0_20, %c0_21] : memref<16x32xf32, #tpu.memory_space<vmem>>, vector<16x32xf32>
      tpu.vector_store %arg7[%c0_20, %c0_21], %30 {strides = array<i32>} : memref<16x32xf32, #tpu.memory_space<vmem>>, vector<16x32xf32>,
    } else {
    }
    %c0 = arith.constant 0 : index
    %c0_1 = arith.constant 0 : index
    %3 = vector.load %arg2[%c0, %c0_1] : memref<16x32xf32, #tpu.memory_space<vmem>>, vector<16x32xf32>
    %c0_2 = arith.constant 0 : index
    %c0_3 = arith.constant 0 : index
    %4 = vector.load %arg3[%c0_2, %c0_3] : memref<32x128xf32, #tpu.memory_space<vmem>>, vector<32x128xf32>
    %cst = arith.constant dense<0.000000e+00> : vector<16x128xf32>
    %5 = tpu.matmul %3, %4, %cst {dimension_numbers = #tpu.dot_dimension_numbers<[1], [0], [0], [1], [0, 0, 1, 1], [], []>} : vector<16x32xf32>, vector<32x128xf32>, vector<16x128xf32> -> vector<16x128xf32>
    %c0_4 = arith.constant 0 : index
    %c0_5 = arith.constant 0 : index
    %6 = vector.load %arg4[%c0_4, %c0_5] : memref<1x128xf32, #tpu.memory_space<vmem>>, vector<1x128xf32>
    %7 = vector.broadcast %6 : vector<1x128xf32> to vector<16x128xf32>
    %8 = arith.addf %5, %7 : vector<16x128xf32>
    %cst_6 = arith.constant 5.000000e-01 : f32
    %9 = vector.broadcast %cst_6 : f32 to vector<16x128xf32>
    %10 = arith.mulf %9, %8 : vector<16x128xf32>
    %cst_7 = arith.constant 4.471500e-02 : f32
    %11 = vector.broadcast %cst_7 : f32 to vector<16x128xf32>
    %12 = arith.mulf %11, %8 : vector<16x128xf32>
    %13 = arith.mulf %12, %8 : vector<16x128xf32>
    %14 = arith.mulf %13, %8 : vector<16x128xf32>
    %15 = arith.addf %8, %14 : vector<16x128xf32>
    %cst_8 = arith.constant 0.797884583 : f32
    %16 = vector.broadcast %cst_8 : f32 to vector<16x128xf32>
    %17 = arith.mulf %16, %15 : vector<16x128xf32>
    %18 = math.tanh %17 : vector<16x128xf32>
    %cst_9 = arith.constant 1.000000e+00 : f32
    %19 = vector.broadcast %cst_9 : f32 to vector<16x128xf32>
    %20 = arith.addf %19, %18 : vector<16x128xf32>
    %21 = arith.mulf %10, %20 : vector<16x128xf32>
    %c0_10 = arith.constant 0 : index
    %c0_11 = arith.constant 0 : index
    %22 = vector.load %arg7[%c0_10, %c0_11] : memref<16x32xf32, #tpu.memory_space<vmem>>, vector<16x32xf32>
    %c0_12 = arith.constant 0 : index
    %c0_13 = arith.constant 0 : index
    %23 = vector.load %arg5[%c0_12, %c0_13] : memref<128x32xf32, #tpu.memory_space<vmem>>, vector<128x32xf32>
    %cst_14 = arith.constant dense<0.000000e+00> : vector<16x32xf32>
    %24 = tpu.matmul %21, %23, %cst_14 {dimension_numbers = #tpu.dot_dimension_numbers<[1], [0], [0], [1], [0, 0, 1, 1], [], []>} : vector<16x128xf32>, vector<128x32xf32>, vector<16x32xf32> -> vector<16x32xf32>
    %25 = arith.addf %22, %24 : vector<16x32xf32>
    %c0_15 = arith.constant 0 : index
    %c0_16 = arith.constant 0 : index
    %26 = vector.load %arg7[%c0_15, %c0_16] : memref<16x32xf32, #tpu.memory_space<vmem>>, vector<16x32xf32>
    tpu.vector_store %arg7[%c0_15, %c0_16], %25 {strides = array<i32>} : memref<16x32xf32, #tpu.memory_space<vmem>>, vector<16x32xf32>,
    %c0_i32_17 = arith.constant 0 : i32
    %27 = arith.cmpi eq, %arg1, %c0_i32_17 : i32
    %28 = arith.extui %27 : i1 to i32
    %c0_i32_18 = arith.constant 0 : i32
    %29 = arith.cmpi ne, %28, %c0_i32_18 : i32
    scf.if %29 {
      %c0_19 = arith.constant 0 : index
      %c0_20 = arith.constant 0 : index
      %30 = vector.load %arg7[%c0_19, %c0_20] : memref<16x32xf32, #tpu.memory_space<vmem>>, vector<16x32xf32>
      %c0_21 = arith.constant 0 : index
      %c0_22 = arith.constant 0 : index
      %31 = vector.load %arg6[%c0_21, %c0_22] : memref<1x32xf32, #tpu.memory_space<vmem>>, vector<1x32xf32>
      %32 = vector.broadcast %31 : vector<1x32xf32> to vector<16x32xf32>
      %33 = arith.addf %30, %32 : vector<16x32xf32>
      %c0_23 = arith.constant 0 : index
      %c0_24 = arith.constant 0 : index
      %34 = vector.load %arg7[%c0_23, %c0_24] : memref<16x32xf32, #tpu.memory_space<vmem>>, vector<16x32xf32>
      tpu.vector_store %arg7[%c0_23, %c0_24], %33 {strides = array<i32>} : memref<16x32xf32, #tpu.memory_space<vmem>>, vector<16x32xf32>,
    } else {
    }
    return
  }
  func.func @transform_0(%arg0: i32, %arg1: i32) -> (i32, i32) {
    %c0_i32 = arith.constant 0 : i32
    %c0_i32_0 = arith.constant 0 : i32
    return %arg0, %c0_i32 : i32, i32
  }
  func.func @transform_1(%arg0: i32, %arg1: i32) -> (i32, i32) {
    %c0_i32 = arith.constant 0 : i32
    %c0_i32_0 = arith.constant 0 : i32
    return %c0_i32, %arg1 : i32, i32
  }
  func.func @transform_2(%arg0: i32, %arg1: i32) -> (i32, i32) {
    %c0_i32 = arith.constant 0 : i32
    %c0_i32_0 = arith.constant 0 : i32
    return %c0_i32, %arg1 : i32, i32
  }
  func.func @transform_3(%arg0: i32, %arg1: i32) -> (i32, i32) {
    %c0_i32 = arith.constant 0 : i32
    %c0_i32_0 = arith.constant 0 : i32
    return %arg1, %c0_i32 : i32, i32
  }
  func.func @transform_4(%arg0: i32, %arg1: i32) -> (i32, i32) {
    %c0_i32 = arith.constant 0 : i32
    %c0_i32_0 = arith.constant 0 : i32
    %c0_i32_1 = arith.constant 0 : i32
    return %c0_i32, %c0_i32_0 : i32, i32
  }
  func.func @transform_5(%arg0: i32, %arg1: i32) -> (i32, i32) {
    %c0_i32 = arith.constant 0 : i32
    %c0_i32_0 = arith.constant 0 : i32
    return %arg0, %c0_i32 : i32, i32
  }
}

</mosaic_0001>

<bundles_post_ra>
// kernel: _mlp_pallas.1
= control target key start
LH: loop header
LB: loop body
LE: loop exit
PB: predicated region body
PF: predicated region fallthrough
CT: control target
= control target key end

     0   :  { %vm25_vm0 = vcmask 261120   ;;  %s542_s0 = inlined_call_operand.vmem [shape: f32[16,32], index: 0, kind: input, shape index: {}]   ;;  %s543_s1 = inlined_call_operand.vmem [shape: f32[32,128], index: 1, kind: input, shape index: {}]   ;;  %s544_s2 = inlined_call_operand.vmem [shape: f32[1,128], index: 2, kind: input, shape index: {}]   ;;  %s545_s3 = inlined_call_operand.vmem [shape: f32[128,32], index: 3, kind: input, shape index: {}]   ;;  %s546_s4 = inlined_call_operand.vmem [shape: f32[1,32], index: 4, kind: input, shape index: {}]   ;;  %s547_s5 = inlined_call_operand.hbm [shape: f32[16,32], index: 5, kind: output, shape index: {}]  }
   0x1   :  { %v30_v0 = vld [vmem:[%s543_s1] sm:$0xff]  ;;  %v31_v1 = vld [vmem:[%s543_s1 + $0x8] sm:$0xff]  ;;  %v32_v2 = vld [vmem:[%s543_s1 + $0x10] sm:$0xff] }
   0x2   :  { %v344_v3 = vpack.c.bf16 %v31_v1, %v30_v0  ;;  %v33_v4 = vld [vmem:[%s543_s1 + $0x18] sm:$0xff]  ;;  %v28_v5 = vld [vmem:[%s542_s0] sm:$0xff]  ;;  %v144_v8 = vld [vmem:[%s545_s3 + $0x8] sm:$0xff] }
   0x3   :  { %v348_v6 = vpack.c.bf16 %v33_v4, %v32_v2  ;;  %306 = vmatprep.mubr.msk.f32.mxu0 %vm25_vm0, %v28_v5  ;;  %v143_v7 = vld [vmem:[%s545_s3] sm:$0xff] }
   0x4   :  { %10 = vsyncpa [#allocation3], 0  ;;  %345 = vmatprep.subr.bf16.mxu0 %v344_v3  ;;  %v352_v9 = vpack.c.bf16 %v144_v8, %v143_v7  ;;  %v29_v10 = vld [vmem:[%s542_s0 + $0x8] sm:$0xff]  ;;  %v145_v11 = vld [vmem:[%s545_s3 + $0x10] sm:$0xff]  ;;  %v416_v32 = vmov 0.0   ;;  %s417_s11 = smov [#allocation2]  }
   0x5   :  { %347 = vmatpush3.bf16.msra.mxu0 %v344_v3  ;;  %v146_v12 = vld [vmem:[%s545_s3 + $0x18] sm:$0xff]  ;;  %v147_v14 = vld [vmem:[%s545_s3 + $0x20] sm:$0xff]  ;;  %v148_v15 = vld [vmem:[%s545_s3 + $0x28] sm:$0xff]  ;;  %27 = vst.msk [vmem:[#allocation2 + $0x8] sm:$0xff] %vm25_vm0, %v416_v32  ;;  %s259_s12 = sshll.u32 %s417_s11, 4  ;;  %s260_s12 = int_to_ptr.vmem [resolvable:$true] %s259_s12 }
   0x6   :  { %349 = vmatprep.subr.bf16.mxu0 %v348_v6  ;;  %353 = vmatprep.subr.bf16.mxu1 %v352_v9  ;;  %v356_v13 = vpack.c.bf16 %v146_v12, %v145_v11  ;;  %v360_v16 = vpack.c.bf16 %v148_v15, %v147_v14  ;;  %v149_v17 = vld [vmem:[%s545_s3 + $0x30] sm:$0xff]  ;;  %v150_v18 = vld [vmem:[%s545_s3 + $0x38] sm:$0xff]  ;;  %v151_v19 = vld [vmem:[%s545_s3 + $0x40] sm:$0xff]  ;;  %26 = vst.msk [vmem:[#allocation2] sm:$0xff] %vm25_vm0, %v416_v32  ;;  %s392_s13 = scalar_lea.vmem %s260_s12, 256  ;;  %p397_p1 = scmp.lt.s32.totalorder %s260_s12, %s260_s12 }
   0x7   :  { %355 = vmatpush3.bf16.msra.mxu1 %v352_v9  ;;  %v364_v20 = vpack.c.bf16 %v150_v18, %v149_v17  ;;  %v152_v21 = vld [vmem:[%s545_s3 + $0x48] sm:$0xff]  ;;  %v153_v23 = vld [vmem:[%s545_s3 + $0x50] sm:$0xff]  ;;  %v154_v24 = vld [vmem:[%s545_s3 + $0x58] sm:$0xff]  ;;  %p393_p0 = scmp.ne.s32.totalorder %s260_s12, %s392_s13  ;;  %p398_p2 = scmp.lt.s32.totalorder %s392_s13, %s392_s13 }
   0x8   :  { %357 = vmatprep.subr.bf16.mxu1 %v356_v13  ;;  %v368_v22 = vpack.c.bf16 %v152_v21, %v151_v19  ;;  %v372_v25 = vpack.c.bf16 %v154_v24, %v153_v23  ;;  %v155_v26 = vld [vmem:[%s545_s3 + $0x60] sm:$0xff]  ;;  %v156_v27 = vld [vmem:[%s545_s3 + $0x68] sm:$0xff]  ;;  %v157_v29 = vld [vmem:[%s545_s3 + $0x70] sm:$0xff] }
   0x9   :  { %351 = vmatpush3.bf16.msra.mxu0 %v348_v6  ;;  %v376_v28 = vpack.c.bf16 %v156_v27, %v155_v26  ;;  %v158_v30 = vld [vmem:[%s545_s3 + $0x78] sm:$0xff]  ;;  %v270_v33 = vld [vmem:[%s544_s2] ss:$0 sm:$0xff]  ;;  %p399_p3 = por %p398_p2, %p397_p1 }
   0xa   :  { %v380_v31 = vpack.c.bf16 %v158_v30, %v157_v29  ;;  %v273_v62 = vld [vmem:[%s546_s4] ss:$0 sm:$0xff] }
   0xb   :  { %359 = vmatpush3.bf16.msra.mxu1 %v356_v13  ;;  %p400_p4 = pnand %p399_p3, %p393_p0 }
   0xc   :  { %307 = vmatmul.mubr.msk.f32.vlgmr.msra.gmra.mrb[0].mxu0 %vm25_vm0, %v29_v10  ;;  %361 = vmatprep.subr.bf16.mxu1 %v360_v16  ;;  %v142_v56 = vld [vmem:[#allocation2 + $0x8] sm:$0xff] }
   0xd   :  { %v141_v57 = vld [vmem:[#allocation2] sm:$0xff] }
   0xf   :  { %363 = vmatpush3.bf16.msra.mxu1 %v360_v16 }
  0x10   :  { %365 = vmatprep.subr.bf16.mxu1 %v364_v20 }
  0x13   :  { %367 = vmatpush3.bf16.msra.mxu1 %v364_v20 }
  0x14   :  { %369 = vmatprep.subr.bf16.mxu1 %v368_v22 }
  0x17   :  { %371 = vmatpush3.bf16.msra.mxu1 %v368_v22 }
  0x18   :  { %373 = vmatprep.subr.bf16.mxu1 %v372_v25 }
  0x1b   :  { %375 = vmatpush3.bf16.msra.mxu1 %v372_v25 }
  0x1c   :  { %377 = vmatprep.subr.bf16.mxu1 %v376_v28 }
  0x1f   :  { %379 = vmatpush3.bf16.msra.mxu1 %v376_v28 }
  0x20   :  { %381 = vmatprep.subr.bf16.mxu1 %v380_v31 }
  0x23   :  { %383 = vmatpush3.bf16.msra.mxu1 %v380_v31 }
  0xdf   :  { %v308_v34 = vpop.f32.mrb[0].mxu0 }
  0xe0   :  { %v120_v35 = vadd.f32 %v308_v34, %v270_v33  ;;  %v114_v36 = vpop.f32.mrb[1].mxu0 }
  0xe1   :  { %v115_v37 = vadd.f32 %v270_v33, %v114_v36 }
  0xe2   :  { %v126_v38 = vmul.f32 0.044715, %v120_v35  ;;  %v124_v53 = vmul.f32 0.5, %v120_v35 }
  0xe3   :  { %v125_v39 = vmul.f32 0.044715, %v115_v37  ;;  %v123_v51 = vmul.f32 0.5, %v115_v37 }
  0xe4   :  { %v128_v40 = vmul.f32 %v126_v38, %v120_v35 }
  0xe5   :  { %v127_v41 = vmul.f32 %v125_v39, %v115_v37 }
  0xe6   :  { %v130_v42 = vmul.f32 %v128_v40, %v120_v35 }
  0xe7   :  { %v129_v43 = vmul.f32 %v127_v41, %v115_v37 }
  0xe8   :  { %v132_v44 = vadd.f32 %v130_v42, %v120_v35 }
  0xe9   :  { %v131_v45 = vadd.f32 %v129_v43, %v115_v37 }
  0xea   :  { %v134_v46 = vmul.f32 0.7978846, %v132_v44 }
  0xeb   :  { %v133_v47 = vmul.f32 0.7978846, %v131_v45 }
  0xec   :  { %388 = vtanh.f32 %v134_v46 }
  0xed   :  { %390 = vtanh.f32 %v133_v47 }
  0xf6   :  { %v389_v48 = vpop.eup %388 }
  0xf7   :  { %v391_v49 = vpop.eup %390  ;;  %v138_v50 = vadd.f32 1.0, %v389_v48 }
  0xf8   :  { %v137_v52 = vadd.f32 1.0, %v391_v49 }
  0xf9   :  { %v140_v55 = vmul.f32 %v138_v50, %v124_v53 }
  0xfa   :  { %v139_v54 = vmul.f32 %v137_v52, %v123_v51 }
  0xfc   :  { %341 = vmatprep.mubr.f32.mxu1 %v139_v54 }
  0xfd   :  { %342 = vmatmul.mubr.f32.vlgmr.msra.gmra.mrb[0].mxu1 %v140_v55 }
 0x1d0   :  { %v343_v58 = vpop.f32.mrb[0].mxu1 }
 0x1d1   :  { %v235_v59 = vadd.f32 %v343_v58, %v142_v56  ;;  %v225_v60 = vpop.f32.mrb[1].mxu1 }
 0x1d2   :  { %v234_v61 = vadd.f32 %v225_v60, %v141_v57 }
 0x1d3   :  { %237 = vst.msk [vmem:[#allocation2 + $0x8] sm:$0xff] %vm25_vm0, %v235_v59 }
 0x1d4   :  { %236 = vst.msk [vmem:[#allocation2] sm:$0xff] %vm25_vm0, %v234_v61 }
 0x1da   :  { %v242_v63 = vld [vmem:[#allocation2 + $0x8] sm:$0xff] }
 0x1db   :  { %v241_v0 = vld [vmem:[#allocation2] sm:$0xff]  ;;  %v251_v1 = vadd.f32 %v273_v62, %v242_v63 }
 0x1dc   :  { %v250_v2 = vadd.f32 %v273_v62, %v241_v0 }
 0x1dd   :  { %253 = vst.msk [vmem:[#allocation2 + $0x8] sm:$0xff] %vm25_vm0, %v251_v1 }
 0x1de   :  { %252 = vst.msk [vmem:[#allocation2] sm:$0xff] %vm25_vm0, %v250_v2 }
 0x1df   :  { %403 = shalt.err (!%p400_p4)
}
 0x1e0   :  { %s404_s15 = scalar_lea.hbm %s547_s5, 256 }
 0x1e1   :  { %p405_p5 = scmp.ne.s32.totalorder %s547_s5, %s404_s15  ;;  %p408_p6 = scmp.lt.u32.totalorder %s404_s15, %s547_s5 }
 0x1e3   :  { %p410_p7 = pnand %p408_p6, %p405_p5 }
 0x1e5   :  { %413 = shalt.err (!%p410_p7)
}
 0x1e6   :  { %s418_s19 = smov 128   ;;  %s419_s20 = smov 8  }
 0x1e7   :  { %265 = dma.vmem_to_hbm [thread:$0]  %s260_s12, 256, %s547_s5, [#allocation3], %s418_s19, %s418_s19, %s419_s20  }
 0x1e8   :  { %414 = dma.done.wait [#allocation3], 256  }
 0x1e9   :  { %415 = vsyncadd [#allocation3], 4294967040 }
 0x1ea   :  { %269 = vsyncpa [#allocation3], 1 }

</bundles_post_ra>
